<compile_context>
chip_gen: v6e
topology: v6e:2x2x1
jax: 0.10.0
libtpu: 0.0.40
codegen_flags: <defaults>
</compile_context>

<pallas_src>
import functools

import jax
import jax.numpy as jnp
from jax import lax
from jax.experimental import pallas as pl
from jax.experimental.pallas import tpu as pltpu

# Plain Python float (NOT a jnp array): jnp scalars created at module scope get
# captured as jaxpr constants, which pallas_call rejects.
_NEG = -1.0e30    # finite "minus infinity" (avoids inf - inf -> NaN)


# -----------------------------------------------------------------------------
# Kernel bodies
# -----------------------------------------------------------------------------
def _single_pass_kernel(zi_ref, zj_ref, out_ref, *, inv_temp, batch_size,
                        batch_tile, ragged_batch):
    """nc == 1 specialization: the whole class axis is resident in one block,
    so softmax(a)/logsumexp(b) are computed directly in-tile (no online
    softmax carry, no scratch, no init/finalize epilogues)."""
    a = zi_ref[...].astype(jnp.float32)            # anchor logits   [TB, C]
    b = zj_ref[...].astype(jnp.float32)            # positive logits [TB, C]
    if inv_temp != 1.0:                            # temperature fused in-kernel
        a = a * inv_temp
        b = b * inv_temp
    if ragged_batch:
        # Pad rows of the last batch tile contain undefined block padding;
        # zero them so every intermediate stays finite, drop them from the sum.
        row = (lax.broadcasted_iota(jnp.int32, (a.shape[0], 1), 0)
               + pl.program_id(0) * batch_tile)
        valid = row < batch_size
        a = jnp.where(valid, a, 0.0)
        b = jnp.where(valid, b, 0.0)

    m_a = jnp.max(a, axis=-1, keepdims=True)
    m_b = jnp.max(b, axis=-1, keepdims=True)
    p = jnp.exp(a - m_a)                           # unnormalized softmax(a)
    s_a = jnp.sum(p, axis=-1, keepdims=True)
    # TODO(synk): on v7x (EUP-bound with bf16 inputs) evaluate exp(b - m_b) in
    # bf16 with f32 accumulation, gated by an accuracy check.
    s_b = jnp.sum(jnp.exp(b - m_b), axis=-1, keepdims=True)
    lse_b = m_b + jnp.log(s_b)
    t_ab = jnp.sum(p * b, axis=-1, keepdims=True)
    # loss_row = logsumexp(b) - sum_c softmax(a)_c * b_c
    loss_rows = lse_b - t_ab / s_a
    if ragged_batch:
        loss_rows = jnp.where(valid, loss_rows, 0.0)
    out_ref[...] = jnp.full(out_ref.shape, jnp.sum(loss_rows), jnp.float32)


def _streamed_kernel(zi_ref, zj_ref, out_ref, m_a, s_a, m_b, s_b, t_ab, *,
                     inv_temp, num_classes, class_tile, batch_size, batch_tile,
                     ragged_classes, ragged_batch):
    """nc > 1: flash-style streaming reduction over the class axis.
    Running stats per batch row in VMEM scratch; finalize on the last step."""
    i = pl.program_id(0)                 # batch tile           ("parallel")
    j = pl.program_id(1)                 # class-reduction step ("arbitrary")
    nc = pl.num_programs(1)

    @pl.when(j == 0)
    def _init():
        m_a[...] = jnp.full(m_a.shape, _NEG, jnp.float32)
        m_b[...] = jnp.full(m_b.shape, _NEG, jnp.float32)
        s_a[...] = jnp.zeros(s_a.shape, jnp.float32)
        s_b[...] = jnp.zeros(s_b.shape, jnp.float32)
        t_ab[...] = jnp.zeros(t_ab.shape, jnp.float32)

    a = zi_ref[...].astype(jnp.float32)
    b = zj_ref[...].astype(jnp.float32)
    if inv_temp != 1.0:
        a = a * inv_temp
        b = b * inv_temp
    if ragged_batch:
        # Keep pad rows finite every step (their loss is dropped in finalize).
        row = (lax.broadcasted_iota(jnp.int32, (a.shape[0], 1), 0)
               + i * batch_tile)
        rvalid = row < batch_size
        a = jnp.where(rvalid, a, 0.0)
        b = jnp.where(rvalid, b, 0.0)

    # TODO(synk): lane-parallel (tb, 128) running stats (combine across lanes
    # only in finalize) would remove the per-step XLU reductions; left out
    # because nc == 1 (single-pass kernel) is the common regime.
    def update(a_t, b_t):
        m_a_new = jnp.maximum(m_a[...], jnp.max(a_t, axis=-1, keepdims=True))
        m_b_new = jnp.maximum(m_b[...], jnp.max(b_t, axis=-1, keepdims=True))
        alpha_a = jnp.exp(m_a[...] - m_a_new)
        alpha_b = jnp.exp(m_b[...] - m_b_new)
        p = jnp.exp(a_t - m_a_new)
        s_a[...] = alpha_a * s_a[...] + jnp.sum(p, axis=-1, keepdims=True)
        s_b[...] = alpha_b * s_b[...] + jnp.sum(jnp.exp(b_t - m_b_new),
                                                axis=-1, keepdims=True)
        t_ab[...] = alpha_a * t_ab[...] + jnp.sum(p * b_t, axis=-1,
                                                  keepdims=True)
        m_a[...] = m_a_new
        m_b[...] = m_b_new

    if ragged_classes:
        # Only the last class tile has padded columns: keep every other step
        # mask-free (removes per-step VPU filler, per the perf review).
        @pl.when(j == nc - 1)
        def _masked():
            col = lax.broadcasted_iota(jnp.int32, a.shape, 1) + j * class_tile
            cvalid = col < num_classes
            update(jnp.where(cvalid, a, _NEG), jnp.where(cvalid, b, _NEG))

        @pl.when(j != nc - 1)
        def _unmasked():
            update(a, b)
    else:
        update(a, b)

    @pl.when(j == nc - 1)
    def _finalize():
        # loss_row = logsumexp(b) - sum_c softmax(a)_c * b_c
        lse_b = m_b[...] + jnp.log(s_b[...])
        # plain divide (tiny (tb,1) op); pl.reciprocal(approx=True) is an
        # optional micro-opt but is skipped for interpret-mode portability.
        loss_rows = lse_b - t_ab[...] / s_a[...]
        if ragged_batch:
            row = (lax.broadcasted_iota(jnp.int32, loss_rows.shape, 0)
                   + i * batch_tile)
            loss_rows = jnp.where(row < batch_size, loss_rows, 0.0)
        out_ref[...] = jnp.full(out_ref.shape, jnp.sum(loss_rows), jnp.float32)


# -----------------------------------------------------------------------------
# Generation-aware sizing
# -----------------------------------------------------------------------------
def _vmem_budget(itemsize):
    """Return (per-input block-bytes target, vmem_limit_bytes).

    v5e/v6e (128 MiB VMEM): ~64 MiB scoped limit, ~8-10 MiB per input block.
    v7x (64 MiB per TC):     ~44 MiB scoped limit, ~5-7 MiB per input block.
    The block target reserves room for 2 inputs x 2 pipeline buffers plus ~2
    f32 compute temporaries of block extent (larger relative to the block for
    sub-32-bit inputs, since the kernel upcasts in-regs).
    """
    try:
        vmem = int(pltpu.get_tpu_info().vmem_capacity_bytes)
    except Exception:  # interpret mode / non-TPU backend
        vmem = 0
    if vmem >= (100 << 20):        # v5e / v6e class
        limit = 64 << 20
    else:                          # v7x class, or unknown -> be conservative
        limit = 44 << 20
    f32_scale = max(4 // max(int(itemsize), 1), 1)
    block = int(limit * 0.9) // (4 + 2 * f32_scale)
    block = max(min(block, 12 << 20), 2 << 20)
    return block, limit


def _align_rows(tb, batch, sub):
    """Legal row-tile: multiple of the packed sublane size, or the full dim."""
    tb = int(min(tb, batch))
    if tb >= batch:
        return int(batch)
    tb = (tb // sub) * sub
    if tb <= 0:
        tb = min(sub, batch)
    return int(tb)


def _choose_tiles(batch, classes, itemsize, block_bytes):
    """Pick (tb, tc). Prefers tc == classes (single-pass kernel); ensures
    >= 2 batch tiles when batch >= 16 (v7x two-TC sharding) and >= 3 when the
    per-input bytes exceed ~1 MiB (DMA/compute overlap)."""
    itemsize = max(int(itemsize), 1)
    sub = max(8, 32 // itemsize)              # 8 f32 / 16 bf16 / 32 int8 rows
    row_bytes = classes * itemsize

    if row_bytes * min(batch, sub) <= block_bytes:
        # --- full class axis resident: nc == 1 -------------------------------
        tb_cap = max(block_bytes // row_bytes, 1)
        min_tiles = 1
        if batch >= 16:
            min_tiles = 2                     # use both v7x TensorCores
        if batch * row_bytes > (1 << 20):
            min_tiles = max(min_tiles, 3)     # enough steps to pipeline DMA
        want = pl.cdiv(batch, min_tiles)
        tb = _align_rows(min(tb_cap, want), batch, sub)
        return tb, int(classes)

    # --- class axis too large: stream over it (nc > 1) ------------------------
    tb = min(batch, 64)                        # amortize epilogue / scratch
    if batch >= 16:
        tb = min(tb, pl.cdiv(batch, 2))        # keep both TCs busy
    tb = _align_rows(tb, batch, sub)
    tc = (block_bytes // (tb * itemsize) // 128) * 128
    tc = int(min(max(tc, 512 if classes >= 512 else 128), classes))
    return int(tb), tc


# -----------------------------------------------------------------------------
# Wrapper
# -----------------------------------------------------------------------------
def distill_loss(z_i, z_j, temperature=1.0, *, block_bytes=None):
    """Pallas TPU implementation of DistillLoss.forward. Returns scalar f32.

    Inputs may be f32 or bf16 (bf16 recommended on v5e/v6e: halves HBM bytes;
    the kernel upcasts to f32 in-registers).
    """
    batch = z_i.shape[0]
    z_i = z_i.reshape(batch, -1)
    z_j = z_j.reshape(batch, -1)
    classes = z_i.shape[1]
    assert z_j.shape == (batch, classes)

    if classes == 1:
        # Degenerate module branch: plain MSE over [B, 1].
        # TODO(synk): trivial elementwise mean; left to fused XLA rather than a
        # 1-lane Pallas kernel which would be strictly slower.
        d = z_i.astype(jnp.float32) - z_j.astype(jnp.float32)
        return jnp.mean(d * d)

    auto_block, vmem_limit = _vmem_budget(z_i.dtype.itemsize)
    if block_bytes is None:
        block_bytes = auto_block
    tb, tc = _choose_tiles(batch, classes, z_i.dtype.itemsize, block_bytes)
    nb = pl.cdiv(batch, tb)
    nc = pl.cdiv(classes, tc)

    common = dict(
        inv_temp=float(1.0 / temperature),   # Python float -> literal, no capture
        batch_size=batch,
        batch_tile=tb,
        ragged_batch=(batch % tb != 0),
    )

    if nc == 1:
        kernel = functools.partial(_single_pass_kernel, **common)
        grid_spec = pltpu.PrefetchScalarGridSpec(
            num_scalar_prefetch=0,
            grid=(nb,),
            in_specs=[pl.BlockSpec((tb, tc), lambda i: (i, 0)),
                      pl.BlockSpec((tb, tc), lambda i: (i, 0))],
            out_specs=pl.BlockSpec((1, 8, 128), lambda i: (i, 0, 0)),
        )
        dims = ("parallel",)
    else:
        kernel = functools.partial(
            _streamed_kernel, **common,
            num_classes=classes, class_tile=tc,
            ragged_classes=(classes % tc != 0))
        grid_spec = pltpu.PrefetchScalarGridSpec(
            num_scalar_prefetch=0,
            grid=(nb, nc),                               # reduction axis last
            in_specs=[pl.BlockSpec((tb, tc), lambda i, j: (i, j)),
                      pl.BlockSpec((tb, tc), lambda i, j: (i, j))],
            out_specs=pl.BlockSpec((1, 8, 128), lambda i, j: (i, 0, 0)),
            scratch_shapes=[pltpu.VMEM((tb, 1), jnp.float32)] * 5,
        )
        dims = ("parallel", "arbitrary")

    partials = pl.pallas_call(
        kernel,
        out_shape=jax.ShapeDtypeStruct((nb, 8, 128), jnp.float32),
        grid_spec=grid_spec,
        compiler_params=pltpu.CompilerParams(
            dimension_semantics=dims,
            vmem_limit_bytes=vmem_limit,
        ),
    )(z_i, z_j)

    # Final 'mean' reduction over the *global* batch, in plain XLA.
    return jnp.sum(partials[:, 0, 0]) / batch


# -----------------------------------------------------------------------------
# Demo / correctness checks
# -----------------------------------------------------------------------------
if __name__ == "__main__":
    key = jax.random.PRNGKey(0)
    k1, k2, k3, k4 = jax.random.split(key, 4)

    def ref_loss(zi, zj, t=1.0):
        b = zi.shape[0]
        zi2 = zi.reshape(b, -1).astype(jnp.float32) / t
        zj2 = zj.reshape(b, -1).astype(jnp.float32) / t
        p = jax.nn.softmax(zi2, axis=-1)
        return jnp.mean(-jnp.sum(p * jax.nn.log_softmax(zj2, axis=-1), axis=-1))

    # Small shapes consistent with the module (inputs flattened from dim 1).
    batch, ch, feat = 8, 4, 16                    # flattens to (8, 64)
    z_i = jax.random.normal(k1, (batch, ch, feat), dtype=jnp.float32)
    z_j = jax.random.normal(k2, (batch, ch, feat), dtype=jnp.float32)

    loss = distill_loss(z_i, z_j, temperature=1.0)
    jax.block_until_ready(loss)
    assert jnp.allclose(loss, ref_loss(z_i, z_j), atol=1e-5, rtol=1e-5), loss

    # Temperature != 1 (scaling fused in-kernel).
    loss_t = distill_loss(z_i, z_j, temperature=3.0)
    jax.block_until_ready(loss_t)
    assert jnp.allclose(loss_t, ref_loss(z_i, z_j, 3.0),
                        atol=1e-5, rtol=1e-5), loss_t

    # bf16 inputs (recommended on v5e/v6e; upcast to f32 in-regs).
    loss_bf = distill_loss(z_i.astype(jnp.bfloat16), z_j.astype(jnp.bfloat16))
    jax.block_until_ready(loss_bf)
    assert jnp.allclose(loss_bf,
                        ref_loss(z_i.astype(jnp.bfloat16),
                                 z_j.astype(jnp.bfloat16)),
                        atol=1e-4, rtol=1e-4), loss_bf

    # Ragged batch + multiple batch tiles (single-pass kernel).
    zi_r = jax.random.normal(k3, (18, 256), dtype=jnp.float32)
    zj_r = jax.random.normal(k4, (18, 256), dtype=jnp.float32)
    loss_r = distill_loss(zi_r, zj_r)
    jax.block_until_ready(loss_r)
    assert jnp.allclose(loss_r, ref_loss(zi_r, zj_r),
                        atol=1e-5, rtol=1e-5), loss_r

    # Streamed (nc > 1) path with ragged class + batch tiles, forced via a tiny
    # block budget so the online-softmax kernel is exercised at small shapes.
    zi_s = jax.random.normal(k3, (18, 600), dtype=jnp.float32)
    zj_s = jax.random.normal(k4, (18, 600), dtype=jnp.float32)
    loss_s = distill_loss(zi_s, zj_s, temperature=2.0, block_bytes=4096)
    jax.block_until_ready(loss_s)
    assert jnp.allclose(loss_s, ref_loss(zi_s, zj_s, 2.0),
                        atol=1e-5, rtol=1e-5), loss_s

    # Degenerate 1-feature branch -> MSE.
    a1 = jax.random.normal(k3, (4, 1), dtype=jnp.float32)
    b1 = jax.random.normal(k4, (4, 1), dtype=jnp.float32)
    mse = distill_loss(a1, b1)
    jax.block_until_ready(mse)
    assert jnp.allclose(mse, jnp.mean((a1 - b1) ** 2), atol=1e-6), mse

    print("KERNEL_OK")
</pallas_src>

<mosaic_0001>
module attributes {stable_mosaic.version = 11 : i64} {
  func.func @_single_pass_kernel(%arg0: i32, %arg1: memref<8x64xf32, #tpu.memory_space<vmem>>, %arg2: memref<8x64xf32, #tpu.memory_space<vmem>>, %arg3: memref<1x8x128xf32, #tpu.memory_space<vmem>>) attributes {dimension_semantics = [#tpu.dimension_semantics<parallel>], iteration_bounds = array<i64: 1>, scalar_prefetch = 0 : i64, scratch_operands = 0 : i64, tpu.core_type = #tpu.core_type<tc>, window_params = [{transform_indices = @transform_0, window_bounds = array<i64: 8, 64>}, {transform_indices = @transform_1, window_bounds = array<i64: 8, 64>}, {transform_indices = @transform_2, window_bounds = array<i64: 1, 8, 128>}]} {
    %c0 = arith.constant 0 : index
    %c0_0 = arith.constant 0 : index
    %0 = vector.load %arg1[%c0, %c0_0] : memref<8x64xf32, #tpu.memory_space<vmem>>, vector<8x64xf32>
    %c0_1 = arith.constant 0 : index
    %c0_2 = arith.constant 0 : index
    %1 = vector.load %arg2[%c0_1, %c0_2] : memref<8x64xf32, #tpu.memory_space<vmem>>, vector<8x64xf32>
    %cst = arith.constant dense<0xFF800000> : vector<8xf32>
    %2 = vector.multi_reduction <maximumf>, %0, %cst [1] : vector<8x64xf32> to vector<8xf32>
    %3 = vector.shape_cast %2 : vector<8xf32> to vector<8x1xf32>
    %cst_3 = arith.constant dense<0xFF800000> : vector<8xf32>
    %4 = vector.multi_reduction <maximumf>, %1, %cst_3 [1] : vector<8x64xf32> to vector<8xf32>
    %5 = vector.shape_cast %4 : vector<8xf32> to vector<8x1xf32>
    %6 = vector.broadcast %3 : vector<8x1xf32> to vector<8x64xf32>
    %7 = arith.subf %0, %6 : vector<8x64xf32>
    %8 = math.exp %7 : vector<8x64xf32>
    %cst_4 = arith.constant dense<0.000000e+00> : vector<8xf32>
    %9 = vector.multi_reduction <add>, %8, %cst_4 [1] : vector<8x64xf32> to vector<8xf32>
    %10 = vector.shape_cast %9 : vector<8xf32> to vector<8x1xf32>
    %11 = vector.broadcast %5 : vector<8x1xf32> to vector<8x64xf32>
    %12 = arith.subf %1, %11 : vector<8x64xf32>
    %13 = math.exp %12 : vector<8x64xf32>
    %cst_5 = arith.constant dense<0.000000e+00> : vector<8xf32>
    %14 = vector.multi_reduction <add>, %13, %cst_5 [1] : vector<8x64xf32> to vector<8xf32>
    %15 = vector.shape_cast %14 : vector<8xf32> to vector<8x1xf32>
    %16 = math.log %15 : vector<8x1xf32>
    %17 = arith.addf %5, %16 : vector<8x1xf32>
    %18 = arith.mulf %8, %1 : vector<8x64xf32>
    %cst_6 = arith.constant dense<0.000000e+00> : vector<8xf32>
    %19 = vector.multi_reduction <add>, %18, %cst_6 [1] : vector<8x64xf32> to vector<8xf32>
    %20 = vector.shape_cast %19 : vector<8xf32> to vector<8x1xf32>
    %21 = arith.divf %20, %10 : vector<8x1xf32>
    %22 = arith.subf %17, %21 : vector<8x1xf32>
    %23 = vector.shape_cast %22 : vector<8x1xf32> to vector<1x8x1xf32>
    %cst_7 = arith.constant dense<0.000000e+00> : vector<1xf32>
    %24 = vector.multi_reduction <add>, %23, %cst_7 [1, 2] : vector<1x8x1xf32> to vector<1xf32>
    %25 = vector.shape_cast %24 : vector<1xf32> to vector<1x1x1xf32>
    %26 = vector.extract %25[0, 0, 0] : f32 from vector<1x1x1xf32>
    %27 = vector.broadcast %26 : f32 to vector<1x8x128xf32>
    %c0_8 = arith.constant 0 : index
    %c0_9 = arith.constant 0 : index
    %c0_10 = arith.constant 0 : index
    %28 = vector.load %arg3[%c0_8, %c0_9, %c0_10] : memref<1x8x128xf32, #tpu.memory_space<vmem>>, vector<1x8x128xf32>
    tpu.vector_store %arg3[%c0_8, %c0_9, %c0_10], %27 {strides = array<i32>} : memref<1x8x128xf32, #tpu.memory_space<vmem>>, vector<1x8x128xf32>,
    return
  }
  func.func @transform_0(%arg0: i32) -> (i32, i32) {
    %c0_i32 = arith.constant 0 : i32
    %c0_i32_0 = arith.constant 0 : i32
    return %arg0, %c0_i32 : i32, i32
  }
  func.func @transform_1(%arg0: i32) -> (i32, i32) {
    %c0_i32 = arith.constant 0 : i32
    %c0_i32_0 = arith.constant 0 : i32
    return %arg0, %c0_i32 : i32, i32
  }
  func.func @transform_2(%arg0: i32) -> (i32, i32, i32) {
    %c0_i32 = arith.constant 0 : i32
    %c0_i32_0 = arith.constant 0 : i32
    %c0_i32_1 = arith.constant 0 : i32
    return %arg0, %c0_i32, %c0_i32_0 : i32, i32, i32
  }
}

</mosaic_0001>

<bundles_post_ra>
// kernel: tpu_custom_call.1
= control target key start
LH: loop header
LB: loop body
LE: loop exit
PB: predicated region body
PF: predicated region fallthrough
CT: control target
= control target key end

     0   :  { %7 = vsyncpa [#allocation3], 0  ;;  %s207_s0 = inlined_call_operand.hbm [shape: f32[8,64], index: 0, kind: input, shape index: {}]   ;;  %s208_s1 = inlined_call_operand.hbm [shape: f32[8,64], index: 1, kind: input, shape index: {}]   ;;  %s209_s2 = inlined_call_operand.hbm [shape: f32[1,8,128], index: 2, kind: output, shape index: {}]  }
   0x1   :  { %8 = vsyncpa [#allocation6], 0 }
   0x2   :  { %9 = vsyncpa [#allocation4], 0  ;;  %s175_s9 = smov [#allocation2]   ;;  %s176_s11 = smov [#allocation5]  }
   0x3   :  { %s16_s10 = sshll.u32 %s175_s9, 4  ;;  %s26_s12 = sshll.u32 %s176_s11, 4  ;;  %s17_s10 = int_to_ptr.vmem [resolvable:$true] %s16_s10  ;;  %s27_s12 = int_to_ptr.vmem [resolvable:$true] %s26_s12 }
   0x4   :  { %s117_s13 = scalar_lea.vmem %s17_s10, 128  ;;  %p122_p1 = scmp.lt.s32.totalorder %s17_s10, %s17_s10 }
   0x5   :  { %p118_p0 = scmp.ne.s32.totalorder %s17_s10, %s117_s13  ;;  %p123_p2 = scmp.lt.s32.totalorder %s117_s13, %s117_s13 }
   0x7   :  { %p124_p3 = por %p123_p2, %p122_p1 }
   0x9   :  { %p125_p4 = pnand %p124_p3, %p118_p0 }
   0xb   :  { %128 = shalt.err (!%p125_p4)
}
   0xc   :  { %19 = dma.hbm_to_vmem [thread:$0]  %s207_s0, 128, %s17_s10, [#allocation3]  }
   0xd   :  { %s137_s16 = scalar_lea.vmem %s27_s12, 128  ;;  %p142_p6 = scmp.lt.s32.totalorder %s27_s12, %s27_s12 }
   0xe   :  { %p138_p5 = scmp.ne.s32.totalorder %s27_s12, %s137_s16  ;;  %p143_p7 = scmp.lt.s32.totalorder %s137_s16, %s137_s16 }
  0x10   :  { %p144_p8 = por %p143_p7, %p142_p6 }
  0x12   :  { %p145_p9 = pnand %p144_p8, %p138_p5 }
  0x14   :  { %148 = shalt.err (!%p145_p9)
}
  0x15   :  { %29 = dma.hbm_to_vmem [thread:$0]  %s208_s1, 128, %s27_s12, [#allocation6]  }
  0x16   :  { %169 = dma.done.wait [#allocation3], 128  }
  0x17   :  { %170 = vsyncadd [#allocation3], 4294967168 }
  0x18   :  { %171 = dma.done.wait [#allocation6], 128  }
  0x19   :  { %172 = vsyncadd [#allocation6], 4294967168  ;;  %vm38_vm0 = vcmask 523264   ;;  %v37_v0 = vld [vmem:[#allocation5] sm:$0xff]  ;;  %v36_v1 = vld [vmem:[#allocation2] sm:$0xff]  ;;  %vm67_vm1 = vcmask 7168  }
  0x1a   :  { %v42_v2 = vsel %vm38_vm0, %v37_v0, -inf  ;;  %v39_v3 = vsel %vm38_vm0, %v36_v1, -inf  ;;  %s177_s0 = smov [#allocation7]  }
  0x1b   :  { %43 = vmax.xlane.f32.xlu0 %v42_v2  ;;  %s86_s1 = sshll.u32 %s177_s0, 4  ;;  %s87_s1 = int_to_ptr.vmem [resolvable:$true] %s86_s1 }
  0x1c   :  { %s149_s20 = scalar_lea.vmem %s87_s1, 128  ;;  %p154_p11 = scmp.lt.s32.totalorder %s87_s1, %s87_s1 }
  0x1d   :  { %p150_p10 = scmp.ne.s32.totalorder %s87_s1, %s149_s20  ;;  %p155_p12 = scmp.lt.s32.totalorder %s149_s20, %s149_s20 }
  0x1f   :  { %40 = vmax.xlane.f32.xlu0 %v39_v3  ;;  %p156_p13 = por %p155_p12, %p154_p11 }
  0x21   :  { %p157_p0 = pnand %p156_p13, %p150_p10 }
  0xa4   :  { %v44_v4 = vpop.xlane.xlu0 %43 }
  0xa5   :  { %v51_v5 = vsub.f32 %v37_v0, %v44_v4 }
  0xa7   :  { %v52_v6 = vmul.f32 1.442695, %v51_v5 }
  0xa8   :  { %v41_v7 = vpop.xlane.xlu0 %40 }
  0xa9   :  { %101 = vpow2.f32 %v52_v6  ;;  %v45_v8 = vsub.f32 %v36_v1, %v41_v7 }
  0xab   :  { %v46_v9 = vmul.f32 1.442695, %v45_v8 }
  0xad   :  { %103 = vpow2.f32 %v46_v9 }
  0xb6   :  { %v102_v10 = vpop.eup %101 }
  0xb7   :  { %v54_v11 = vsel %vm38_vm0, %v102_v10, 0.0 }
  0xb8   :  { %55 = vadd.xlane.f32.xlu1 %v54_v11 }
  0xba   :  { %v104_v12 = vpop.eup %103 }
  0xbb   :  { %v48_v13 = vsel %vm38_vm0, %v104_v12, 0.0  ;;  %v60_v14 = vmul.f32 %v104_v12, %v37_v0 }
  0xbc   :  { %49 = vadd.xlane.f32.xlu1 %v48_v13 }
  0xbd   :  { %v61_v15 = vsel %vm38_vm0, %v60_v14, 0.0 }
  0xbe   :  { %62 = vadd.xlane.f32.xlu0 %v61_v15 }
 0x141   :  { %v56_v16 = vpop.xlane.xlu1 %55 }
 0x142   :  { %105 = vlog2.f32 %v56_v16 }
 0x145   :  { %v50_v17 = vpop.xlane.xlu1 %49 }
 0x146   :  { %107 = vrcp.f32 %v50_v17 }
 0x147   :  { %v63_v21 = vpop.xlane.xlu0 %62 }
 0x14f   :  { %v106_v18 = vpop.eup %105 }
 0x150   :  { %v58_v19 = vmul.f32 0.6931472, %v106_v18 }
 0x152   :  { %v59_v23 = vadd.f32 %v58_v19, %v44_v4 }
 0x153   :  { %v108_v20 = vpop.eup %107 }
 0x154   :  { %v65_v22 = vmul.f32 %v108_v20, %v63_v21 }
 0x156   :  { %v66_v24 = vsub.f32 %v59_v23, %v65_v22 }
 0x158   :  { %v68_v25 = vsel %vm67_vm1, %v66_v24, 0.0 }
 0x159   :  { %69 = vadd.xlane.f32.xlu1 %v68_v25 }
 0x1e2   :  { %v70_v26 = vpop.xlane.xlu1 %69 }
 0x1e3   :  { %v71_v27 = vrot.slane %v70_v26, 4 }
 0x1e5   :  { %v72_v28 = vadd.f32 %v71_v27, %v70_v26 }
 0x1e7   :  { %v73_v29 = vrot.slane %v72_v28, 2 }
 0x1e9   :  { %v74_v30 = vadd.f32 %v73_v29, %v72_v28 }
 0x1eb   :  { %v75_v31 = vrot.slane %v74_v30, 1 }
 0x1ed   :  { %v76_v32 = vadd.f32 %v75_v31, %v74_v30 }
 0x1ef   :  { %96 = vpush %v76_v32 }
 0x220   :  { %s97_s19 = spop %96 }
 0x221   :  { %v78_v33 = vstv %s97_s19 }
 0x222   :  { %79 = vst [vmem:[#allocation7] sm:$0xff] %v78_v33 }
 0x223   :  { %160 = shalt.err (!%p157_p0)
}
 0x224   :  { %89 = dma.vmem_to_hbm [thread:$0]  %s87_s1, 128, %s209_s2, [#allocation4]  }
 0x225   :  { %173 = dma.done.wait [#allocation4], 128  }
 0x226   :  { %174 = vsyncadd [#allocation4], 4294967168 }
 0x227   :  { %93 = vsyncpa [#allocation3], 1 }
 0x228   :  { %94 = vsyncpa [#allocation6], 1 }
 0x229   :  { %95 = vsyncpa [#allocation4], 1 }

</bundles_post_ra>
